<compile_context>
chip_gen: v7x
topology: tpu7x:2x2x1
jax: 0.10.0
libtpu: 0.0.40
codegen_flags: <defaults>
</compile_context>

<pallas_src>
import jax
import jax.numpy as jnp
import numpy as np
from jax import lax
from jax.experimental import pallas as pl
from jax.experimental.pallas import tpu as pltpu

# --------------------------- config (small, synthetic) ----------------------
BATCH = 4
NUM_CATEGORIES = 8
NUM_FILE_TYPES = 6
NUM_STORAGE_TYPES = 4
META_DIM = 32                 # metadata_embedding_dim
TEXT_DIM = 64                 # text_embedding_dim (stand-in for BERT hidden)
HIDDEN = 64                   # combined_hidden_dim
NUM_ASSET_CATEGORIES = 10
NUM_IMPORTANCE_LEVELS = 5
LN_EPS = 1e-5                 # PyTorch nn.LayerNorm default

HEAD_OUT = NUM_ASSET_CATEGORIES + NUM_IMPORTANCE_LEVELS + 1   # 16
FRONT_K = NUM_CATEGORIES + NUM_FILE_TYPES + NUM_STORAGE_TYPES + 5   # 23
FRONT_K_PAD = 32              # pad fused front-end K to 32
W_LANES = 128                 # lane width of the packed parameter arrays

# lane offsets inside the fused front-end input
CAT_OFF = 0
FT_OFF = NUM_CATEGORIES                       # 8
ST_OFF = NUM_CATEGORIES + NUM_FILE_TYPES      # 14
NUM_OFF = ST_OFF + NUM_STORAGE_TYPES          # 18

# ---- row offsets inside the packed weight array (all multiples of 8) -------
ROW_FRONT = 0                                   # (32, 128) block-diag front end
ROW_FC1   = ROW_FRONT + FRONT_K_PAD             # 32  : (128, 64)
ROW_FC2   = ROW_FC1 + 4 * META_DIM              # 160 : (64, 32)
ROW_TP    = ROW_FC2 + 2 * META_DIM              # 224 : (64, 32)
ROW_CE1M  = ROW_TP + TEXT_DIM                   # 288 : (32, 64)
ROW_CE1T  = ROW_CE1M + META_DIM                 # 320 : (32, 64)
ROW_CE2   = ROW_CE1T + META_DIM                 # 352 : (64, 64)
ROW_HEAD  = ROW_CE2 + HIDDEN                    # 416 : (64, 16)
TOTAL_W_ROWS = ROW_HEAD + HIDDEN                # 480

# ---- row indices inside the packed vector array -----------------------------
V_FRONT_B = 0
V_FC1_B, V_FC1_G, V_FC1_BE = 1, 2, 3
V_FC2_B, V_FC2_G, V_FC2_BE = 4, 5, 6
V_TP_B, V_TP_G, V_TP_BE = 7, 8, 9
V_CE1_B, V_CE1_G, V_CE1_BE = 10, 11, 12
V_CE2_B, V_CE2_G, V_CE2_BE = 13, 14, 15
V_HEAD_B = 16
TOTAL_V_ROWS = 24             # padded to a multiple of 8


# --------------------------------- kernel -----------------------------------
def classifier_kernel(ids_ref, num_ref, cls_ref, w_ref, v_ref, out_ref):
    # Static slices into the packed parameter refs.
    def mm(a, r0, rows, cols):
        return jnp.dot(a, w_ref[r0:r0 + rows, 0:cols],
                       preferred_element_type=jnp.float32)

    def vec(i, d):
        return v_ref[i:i + 1, 0:d]

    def ln_relu(x, gi, bi, d):
        mean = jnp.mean(x, axis=-1, keepdims=True)
        var = jnp.mean(jnp.square(x - mean), axis=-1, keepdims=True)
        y = (x - mean) * lax.rsqrt(var + LN_EPS) * vec(gi, d) + vec(bi, d)
        return jnp.maximum(y, 0.0)          # Dropout -> identity (eval mode)

    # ---- in-kernel fused one-hot: lanes [0:8)=cat, [8:14)=ft, [14:18)=st ----
    # ids arrive pre-offset into the fused lane space (padded entries are -1,
    # which never match), so one iota-compare per field builds the selector.
    ids = ids_ref[...]                                        # (B, 8) int32
    lane = lax.broadcasted_iota(jnp.int32, (ids.shape[0], FRONT_K_PAD), 1)
    oh = ((lane == ids[:, 0:1]) | (lane == ids[:, 1:2]) | (lane == ids[:, 2:3]))
    # numeric features already placed at lanes [18:23) by the wrapper
    x = oh.astype(jnp.float32) + num_ref[...]                 # (B, 32)

    cls = cls_ref[...]                                        # (B, 64)  BERT CLS output

    # ---- AssetMetadataEncoder ----
    # Fused embeddings + numeric projection + concat: one (B,32)@(32,128) matmul.
    combined = mm(x, ROW_FRONT, FRONT_K_PAD, 4 * META_DIM) + vec(V_FRONT_B, 4 * META_DIM)
    h = ln_relu(mm(combined, ROW_FC1, 4 * META_DIM, 2 * META_DIM)
                + vec(V_FC1_B, 2 * META_DIM),
                V_FC1_G, V_FC1_BE, 2 * META_DIM)
    meta = ln_relu(mm(h, ROW_FC2, 2 * META_DIM, META_DIM) + vec(V_FC2_B, META_DIM),
                   V_FC2_G, V_FC2_BE, META_DIM)

    # ---- AssetTextEncoder.text_projection ----
    # TODO(synk): pretrained BertModel forward is not reproducible in-kernel;
    # its CLS vector is supplied as a kernel input.
    text = ln_relu(mm(cls, ROW_TP, TEXT_DIM, META_DIM) + vec(V_TP_B, META_DIM),
                   V_TP_G, V_TP_BE, META_DIM)

    # ---- combined encoder (concat replaced by split-weight matmuls) ----
    e = ln_relu(mm(meta, ROW_CE1M, META_DIM, HIDDEN)
                + mm(text, ROW_CE1T, META_DIM, HIDDEN)
                + vec(V_CE1_B, HIDDEN),
                V_CE1_G, V_CE1_BE, HIDDEN)
    e = ln_relu(mm(e, ROW_CE2, HIDDEN, HIDDEN) + vec(V_CE2_B, HIDDEN),
                V_CE2_G, V_CE2_BE, HIDDEN)

    # ---- merged heads: [category(10) | importance(5) | sentiment(1)] ----
    head = mm(e, ROW_HEAD, HIDDEN, HEAD_OUT) + vec(V_HEAD_B, HEAD_OUT)
    # tanh only on the sentiment lane (EUP op; lane-select on VPU).
    head_lane = lax.broadcasted_iota(jnp.int32, head.shape, 1)
    out_ref[...] = jnp.where(head_lane == HEAD_OUT - 1, jnp.tanh(head), head)


# ----------------------------- parameter setup -------------------------------
def init_params(key):
    ks = iter(jax.random.split(key, 64))

    def w(shape, scale=0.02):
        return (scale * jax.random.normal(next(ks), shape)).astype(jnp.float32)

    def zeros(shape):
        return jnp.zeros(shape, jnp.float32)

    def ones(shape):
        return jnp.ones(shape, jnp.float32)

    D, H, T = META_DIM, HIDDEN, TEXT_DIM
    params = [
        # embeddings
        w((NUM_CATEGORIES, D)), w((NUM_FILE_TYPES, D)), w((NUM_STORAGE_TYPES, D)),
        # numeric_features_projection: Linear(5 -> D)
        w((5, D)), zeros((1, D)),
        # feature_combiner[0]: Linear(4D -> 2D) + LayerNorm(2D)
        w((4 * D, 2 * D)), zeros((1, 2 * D)), ones((1, 2 * D)), zeros((1, 2 * D)),
        # feature_combiner[4]: Linear(2D -> D) + LayerNorm(D)
        w((2 * D, D)), zeros((1, D)), ones((1, D)), zeros((1, D)),
        # text_projection: Linear(T -> D) + LayerNorm(D)
        w((T, D)), zeros((1, D)), ones((1, D)), zeros((1, D)),
        # combined_encoder[0]: Linear(2D -> H) + LayerNorm(H)
        w((2 * D, H)), zeros((1, H)), ones((1, H)), zeros((1, H)),
        # combined_encoder[4]: Linear(H -> H) + LayerNorm(H)
        w((H, H)), zeros((1, H)), ones((1, H)), zeros((1, H)),
        # heads
        w((H, NUM_ASSET_CATEGORIES)), zeros((1, NUM_ASSET_CATEGORIES)),
        w((H, NUM_IMPORTANCE_LEVELS)), zeros((1, NUM_IMPORTANCE_LEVELS)),
        w((H, 1)), zeros((1, 1)),
    ]
    return params


def pack_params(params):
    """Host-side packing into one weight ref and one vector ref."""
    (emb_cat, emb_ft, emb_st,
     num_w, num_b,
     fc1_w, fc1_b, fc1_g, fc1_be,
     fc2_w, fc2_b, fc2_g, fc2_be,
     tp_w, tp_b, tp_g, tp_be,
     ce1_w, ce1_b, ce1_g, ce1_be,
     ce2_w, ce2_b, ce2_g, ce2_be,
     clsf_w, clsf_b, imp_w, imp_b, sent_w, sent_b) = [np.asarray(p) for p in params]

    D = META_DIM

    def pad_lanes(m):
        out = np.zeros((m.shape[0], W_LANES), np.float32)
        out[:, : m.shape[1]] = m
        return out

    # Block-diagonal fused front-end weight: (FRONT_K_PAD, 4D)
    w_front = np.zeros((FRONT_K_PAD, 4 * D), np.float32)
    w_front[CAT_OFF:CAT_OFF + NUM_CATEGORIES, 0:D] = emb_cat
    w_front[FT_OFF:FT_OFF + NUM_FILE_TYPES, D:2 * D] = emb_ft
    w_front[ST_OFF:ST_OFF + NUM_STORAGE_TYPES, 2 * D:3 * D] = emb_st
    w_front[NUM_OFF:NUM_OFF + 5, 3 * D:4 * D] = num_w

    blocks = [
        pad_lanes(w_front),                                       # ROW_FRONT
        pad_lanes(fc1_w),                                         # ROW_FC1
        pad_lanes(fc2_w),                                         # ROW_FC2
        pad_lanes(tp_w),                                          # ROW_TP
        pad_lanes(ce1_w[:D]),                                     # ROW_CE1M
        pad_lanes(ce1_w[D:]),                                     # ROW_CE1T
        pad_lanes(ce2_w),                                         # ROW_CE2
        pad_lanes(np.concatenate([clsf_w, imp_w, sent_w], 1)),    # ROW_HEAD
    ]
    w_pack = np.concatenate(blocks, axis=0)
    assert w_pack.shape == (TOTAL_W_ROWS, W_LANES)

    front_b = np.zeros((1, 4 * D), np.float32)
    front_b[:, 3 * D:4 * D] = num_b
    head_b = np.concatenate([clsf_b, imp_b, sent_b], axis=1)
    vec_rows = [front_b, fc1_b, fc1_g, fc1_be, fc2_b, fc2_g, fc2_be,
                tp_b, tp_g, tp_be, ce1_b, ce1_g, ce1_be, ce2_b, ce2_g, ce2_be,
                head_b]
    v_pack = np.zeros((TOTAL_V_ROWS, W_LANES), np.float32)
    for i, v in enumerate(vec_rows):
        v = v.reshape(1, -1)
        v_pack[i, : v.shape[1]] = v

    return jnp.asarray(w_pack), jnp.asarray(v_pack)


# ------------------------------ pallas wrapper -------------------------------
def make_forward(params):
    w_pack, v_pack = pack_params(params)

    def fwd(cat_ids, ft_ids, st_ids, numeric, cls_out):
        B = numeric.shape[0]
        b_pad = max(8, ((B + 7) // 8) * 8)   # pad batch to f32 sublane count

        # Pre-offset ids into the fused front-end lane space; pad with -1.
        ids3 = jnp.stack([cat_ids.astype(jnp.int32) + CAT_OFF,
                          ft_ids.astype(jnp.int32) + FT_OFF,
                          st_ids.astype(jnp.int32) + ST_OFF], axis=1)     # (B, 3)
        ids = jnp.pad(ids3, ((0, b_pad - B), (0, 8 - 3)), constant_values=-1)

        # Numeric features placed at lanes [NUM_OFF, NUM_OFF+5) of the fused input.
        num_front = jnp.pad(numeric.astype(jnp.float32),
                            ((0, b_pad - B), (NUM_OFF, FRONT_K_PAD - NUM_OFF - 5)))
        cls_p = jnp.pad(cls_out.astype(jnp.float32), ((0, b_pad - B), (0, 0)))

        vmem = lambda: pl.BlockSpec(memory_space=pltpu.MemorySpace.VMEM)
        out = pl.pallas_call(
            classifier_kernel,
            out_shape=jax.ShapeDtypeStruct((b_pad, HEAD_OUT), jnp.float32),
            in_specs=[vmem(), vmem(), vmem(), vmem(), vmem()],
            out_specs=vmem(),
        )(ids, num_front, cls_p, w_pack, v_pack)

        nc, ni = NUM_ASSET_CATEGORIES, NUM_IMPORTANCE_LEVELS
        return {
            "category_logits": out[:B, :nc],
            "importance_logits": out[:B, nc:nc + ni],
            "sentiment": out[:B, nc + ni:nc + ni + 1],   # tanh applied in-kernel
        }

    return jax.jit(fwd)


# --------------------------- pure-JAX reference ------------------------------
def reference_forward(params, cat_ids, ft_ids, st_ids, numeric, cls_out):
    (emb_cat, emb_ft, emb_st,
     num_w, num_b,
     fc1_w, fc1_b, fc1_g, fc1_be,
     fc2_w, fc2_b, fc2_g, fc2_be,
     tp_w, tp_b, tp_g, tp_be,
     ce1_w, ce1_b, ce1_g, ce1_be,
     ce2_w, ce2_b, ce2_g, ce2_be,
     clsf_w, clsf_b, imp_w, imp_b, sent_w, sent_b) = params

    def ln(x, g, b):
        m = jnp.mean(x, -1, keepdims=True)
        v = jnp.mean((x - m) ** 2, -1, keepdims=True)
        return (x - m) / jnp.sqrt(v + LN_EPS) * g + b

    cat_e = emb_cat[cat_ids]
    ft_e = emb_ft[ft_ids]
    st_e = emb_st[st_ids]
    num_e = numeric @ num_w + num_b
    comb = jnp.concatenate([cat_e, ft_e, st_e, num_e], axis=1)
    h = jnp.maximum(ln(comb @ fc1_w + fc1_b, fc1_g, fc1_be), 0.0)
    meta = jnp.maximum(ln(h @ fc2_w + fc2_b, fc2_g, fc2_be), 0.0)
    text = jnp.maximum(ln(cls_out @ tp_w + tp_b, tp_g, tp_be), 0.0)
    c = jnp.concatenate([meta, text], axis=1)
    e = jnp.maximum(ln(c @ ce1_w + ce1_b, ce1_g, ce1_be), 0.0)
    e = jnp.maximum(ln(e @ ce2_w + ce2_b, ce2_g, ce2_be), 0.0)
    return {
        "category_logits": e @ clsf_w + clsf_b,
        "importance_logits": e @ imp_w + imp_b,
        "sentiment": jnp.tanh(e @ sent_w + sent_b),
    }


# ----------------------------------- main ------------------------------------
if __name__ == "__main__":
    root = jax.random.PRNGKey(0)
    k_par, k_cat, k_ft, k_st, k_num, k_cls = jax.random.split(root, 6)

    params = init_params(k_par)

    category_ids = jax.random.randint(k_cat, (BATCH,), 0, NUM_CATEGORIES, jnp.int32)
    file_type_ids = jax.random.randint(k_ft, (BATCH,), 0, NUM_FILE_TYPES, jnp.int32)
    storage_type_ids = jax.random.randint(k_st, (BATCH,), 0, NUM_STORAGE_TYPES, jnp.int32)
    numeric_features = jax.random.normal(k_num, (BATCH, 5), jnp.float32)
    bert_cls_output = jax.random.normal(k_cls, (BATCH, TEXT_DIM), jnp.float32)

    fwd = make_forward(params)
    out = fwd(category_ids, file_type_ids, storage_type_ids,
              numeric_features, bert_cls_output)
    out = jax.block_until_ready(out)

    ref = reference_forward(params, category_ids, file_type_ids, storage_type_ids,
                            numeric_features, bert_cls_output)

    for k in ("category_logits", "importance_logits", "sentiment"):
        np.testing.assert_allclose(np.asarray(out[k]), np.asarray(ref[k]),
                                   rtol=1e-4, atol=1e-4)

    print("KERNEL_OK")
</pallas_src>

<mosaic_0001>
module attributes {stable_mosaic.version = 11 : i64} {
  func.func @classifier_kernel(%arg0: memref<8x8xi32, #tpu.memory_space<vmem>>, %arg1: memref<8x32xf32, #tpu.memory_space<vmem>>, %arg2: memref<8x64xf32, #tpu.memory_space<vmem>>, %arg3: memref<480x128xf32, #tpu.memory_space<vmem>>, %arg4: memref<24x128xf32, #tpu.memory_space<vmem>>, %arg5: memref<8x16xf32, #tpu.memory_space<vmem>>) attributes {dimension_semantics = [], scalar_prefetch = 0 : i64, scratch_operands = 0 : i64, tpu.core_type = #tpu.core_type<tc>} {
    %c0 = arith.constant 0 : index
    %c0_0 = arith.constant 0 : index
    %0 = vector.load %arg0[%c0, %c0_0] : memref<8x8xi32, #tpu.memory_space<vmem>>, vector<8x8xi32>
    %1 = tpu.iota {dimensions = array<i32: 1>} : vector<8x32xi32>
    %2 = vector.extract_strided_slice %0 {offsets = [0, 0], sizes = [8, 1], strides = [1, 1]} : vector<8x8xi32> to vector<8x1xi32>
    %3 = vector.broadcast %2 : vector<8x1xi32> to vector<8x32xi32>
    %4 = arith.cmpi eq, %1, %3 : vector<8x32xi32>
    %5 = vector.extract_strided_slice %0 {offsets = [0, 1], sizes = [8, 1], strides = [1, 1]} : vector<8x8xi32> to vector<8x1xi32>
    %6 = vector.broadcast %5 : vector<8x1xi32> to vector<8x32xi32>
    %7 = arith.cmpi eq, %1, %6 : vector<8x32xi32>
    %8 = arith.ori %4, %7 : vector<8x32xi1>
    %9 = vector.extract_strided_slice %0 {offsets = [0, 2], sizes = [8, 1], strides = [1, 1]} : vector<8x8xi32> to vector<8x1xi32>
    %10 = vector.broadcast %9 : vector<8x1xi32> to vector<8x32xi32>
    %11 = arith.cmpi eq, %1, %10 : vector<8x32xi32>
    %12 = arith.ori %8, %11 : vector<8x32xi1>
    %13 = arith.extui %12 : vector<8x32xi1> to vector<8x32xi32>
    %14 = arith.sitofp %13 : vector<8x32xi32> to vector<8x32xf32>
    %c0_1 = arith.constant 0 : index
    %c0_2 = arith.constant 0 : index
    %15 = vector.load %arg1[%c0_1, %c0_2] : memref<8x32xf32, #tpu.memory_space<vmem>>, vector<8x32xf32>
    %16 = arith.addf %14, %15 : vector<8x32xf32>
    %c0_3 = arith.constant 0 : index
    %c0_4 = arith.constant 0 : index
    %17 = vector.load %arg2[%c0_3, %c0_4] : memref<8x64xf32, #tpu.memory_space<vmem>>, vector<8x64xf32>
    %c0_5 = arith.constant 0 : index
    %c0_6 = arith.constant 0 : index
    %18 = vector.load %arg3[%c0_5, %c0_6] : memref<480x128xf32, #tpu.memory_space<vmem>>, vector<32x128xf32>
    %cst = arith.constant dense<0.000000e+00> : vector<8x128xf32>
    %19 = tpu.matmul %16, %18, %cst {dimension_numbers = #tpu.dot_dimension_numbers<[1], [0], [0], [1], [0, 0, 1, 1], [], []>} : vector<8x32xf32>, vector<32x128xf32>, vector<8x128xf32> -> vector<8x128xf32>
    %c0_7 = arith.constant 0 : index
    %c0_8 = arith.constant 0 : index
    %20 = vector.load %arg4[%c0_7, %c0_8] : memref<24x128xf32, #tpu.memory_space<vmem>>, vector<1x128xf32>
    %21 = vector.broadcast %20 : vector<1x128xf32> to vector<8x128xf32>
    %22 = arith.addf %19, %21 : vector<8x128xf32>
    %c32 = arith.constant 32 : index
    %c0_9 = arith.constant 0 : index
    %23 = vector.load %arg3[%c32, %c0_9] : memref<480x128xf32, #tpu.memory_space<vmem>>, vector<128x64xf32>
    %cst_10 = arith.constant dense<0.000000e+00> : vector<8x64xf32>
    %24 = tpu.matmul %22, %23, %cst_10 {dimension_numbers = #tpu.dot_dimension_numbers<[1], [0], [0], [1], [0, 0, 1, 1], [], []>} : vector<8x128xf32>, vector<128x64xf32>, vector<8x64xf32> -> vector<8x64xf32>
    %c1 = arith.constant 1 : index
    %c0_11 = arith.constant 0 : index
    %25 = vector.load %arg4[%c1, %c0_11] : memref<24x128xf32, #tpu.memory_space<vmem>>, vector<1x64xf32>
    %26 = vector.broadcast %25 : vector<1x64xf32> to vector<8x64xf32>
    %27 = arith.addf %24, %26 : vector<8x64xf32>
    %cst_12 = arith.constant dense<0.000000e+00> : vector<8xf32>
    %28 = vector.multi_reduction <add>, %27, %cst_12 [1] : vector<8x64xf32> to vector<8xf32>
    %29 = vector.shape_cast %28 : vector<8xf32> to vector<8x1xf32>
    %cst_13 = arith.constant 6.400000e+01 : f32
    %30 = vector.broadcast %cst_13 : f32 to vector<8x1xf32>
    %31 = arith.divf %29, %30 : vector<8x1xf32>
    %32 = vector.broadcast %31 : vector<8x1xf32> to vector<8x64xf32>
    %33 = arith.subf %27, %32 : vector<8x64xf32>
    %34 = arith.mulf %33, %33 : vector<8x64xf32>
    %cst_14 = arith.constant dense<0.000000e+00> : vector<8xf32>
    %35 = vector.multi_reduction <add>, %34, %cst_14 [1] : vector<8x64xf32> to vector<8xf32>
    %36 = vector.shape_cast %35 : vector<8xf32> to vector<8x1xf32>
    %cst_15 = arith.constant 6.400000e+01 : f32
    %37 = vector.broadcast %cst_15 : f32 to vector<8x1xf32>
    %38 = arith.divf %36, %37 : vector<8x1xf32>
    %39 = vector.broadcast %31 : vector<8x1xf32> to vector<8x64xf32>
    %40 = arith.subf %27, %39 : vector<8x64xf32>
    %cst_16 = arith.constant 9.99999974E-6 : f32
    %41 = vector.broadcast %cst_16 : f32 to vector<8x1xf32>
    %42 = arith.addf %38, %41 : vector<8x1xf32>
    %43 = math.rsqrt %42 : vector<8x1xf32>
    %44 = vector.broadcast %43 : vector<8x1xf32> to vector<8x64xf32>
    %45 = arith.mulf %40, %44 : vector<8x64xf32>
    %c2 = arith.constant 2 : index
    %c0_17 = arith.constant 0 : index
    %46 = vector.load %arg4[%c2, %c0_17] : memref<24x128xf32, #tpu.memory_space<vmem>>, vector<1x64xf32>
    %47 = vector.broadcast %46 : vector<1x64xf32> to vector<8x64xf32>
    %48 = arith.mulf %45, %47 : vector<8x64xf32>
    %c3 = arith.constant 3 : index
    %c0_18 = arith.constant 0 : index
    %49 = vector.load %arg4[%c3, %c0_18] : memref<24x128xf32, #tpu.memory_space<vmem>>, vector<1x64xf32>
    %50 = vector.broadcast %49 : vector<1x64xf32> to vector<8x64xf32>
    %51 = arith.addf %48, %50 : vector<8x64xf32>
    %cst_19 = arith.constant 0.000000e+00 : f32
    %52 = vector.broadcast %cst_19 : f32 to vector<8x64xf32>
    %53 = arith.maximumf %51, %52 : vector<8x64xf32>
    %c160 = arith.constant 160 : index
    %c0_20 = arith.constant 0 : index
    %54 = vector.load %arg3[%c160, %c0_20] : memref<480x128xf32, #tpu.memory_space<vmem>>, vector<64x32xf32>
    %cst_21 = arith.constant dense<0.000000e+00> : vector<8x32xf32>
    %55 = tpu.matmul %53, %54, %cst_21 {dimension_numbers = #tpu.dot_dimension_numbers<[1], [0], [0], [1], [0, 0, 1, 1], [], []>} : vector<8x64xf32>, vector<64x32xf32>, vector<8x32xf32> -> vector<8x32xf32>
    %c4 = arith.constant 4 : index
    %c0_22 = arith.constant 0 : index
    %56 = vector.load %arg4[%c4, %c0_22] : memref<24x128xf32, #tpu.memory_space<vmem>>, vector<1x32xf32>
    %57 = vector.broadcast %56 : vector<1x32xf32> to vector<8x32xf32>
    %58 = arith.addf %55, %57 : vector<8x32xf32>
    %cst_23 = arith.constant dense<0.000000e+00> : vector<8xf32>
    %59 = vector.multi_reduction <add>, %58, %cst_23 [1] : vector<8x32xf32> to vector<8xf32>
    %60 = vector.shape_cast %59 : vector<8xf32> to vector<8x1xf32>
    %cst_24 = arith.constant 3.200000e+01 : f32
    %61 = vector.broadcast %cst_24 : f32 to vector<8x1xf32>
    %62 = arith.divf %60, %61 : vector<8x1xf32>
    %63 = vector.broadcast %62 : vector<8x1xf32> to vector<8x32xf32>
    %64 = arith.subf %58, %63 : vector<8x32xf32>
    %65 = arith.mulf %64, %64 : vector<8x32xf32>
    %cst_25 = arith.constant dense<0.000000e+00> : vector<8xf32>
    %66 = vector.multi_reduction <add>, %65, %cst_25 [1] : vector<8x32xf32> to vector<8xf32>
    %67 = vector.shape_cast %66 : vector<8xf32> to vector<8x1xf32>
    %cst_26 = arith.constant 3.200000e+01 : f32
    %68 = vector.broadcast %cst_26 : f32 to vector<8x1xf32>
    %69 = arith.divf %67, %68 : vector<8x1xf32>
    %70 = vector.broadcast %62 : vector<8x1xf32> to vector<8x32xf32>
    %71 = arith.subf %58, %70 : vector<8x32xf32>
    %cst_27 = arith.constant 9.99999974E-6 : f32
    %72 = vector.broadcast %cst_27 : f32 to vector<8x1xf32>
    %73 = arith.addf %69, %72 : vector<8x1xf32>
    %74 = math.rsqrt %73 : vector<8x1xf32>
    %75 = vector.broadcast %74 : vector<8x1xf32> to vector<8x32xf32>
    %76 = arith.mulf %71, %75 : vector<8x32xf32>
    %c5 = arith.constant 5 : index
    %c0_28 = arith.constant 0 : index
    %77 = vector.load %arg4[%c5, %c0_28] : memref<24x128xf32, #tpu.memory_space<vmem>>, vector<1x32xf32>
    %78 = vector.broadcast %77 : vector<1x32xf32> to vector<8x32xf32>
    %79 = arith.mulf %76, %78 : vector<8x32xf32>
    %c6 = arith.constant 6 : index
    %c0_29 = arith.constant 0 : index
    %80 = vector.load %arg4[%c6, %c0_29] : memref<24x128xf32, #tpu.memory_space<vmem>>, vector<1x32xf32>
    %81 = vector.broadcast %80 : vector<1x32xf32> to vector<8x32xf32>
    %82 = arith.addf %79, %81 : vector<8x32xf32>
    %cst_30 = arith.constant 0.000000e+00 : f32
    %83 = vector.broadcast %cst_30 : f32 to vector<8x32xf32>
    %84 = arith.maximumf %82, %83 : vector<8x32xf32>
    %c224 = arith.constant 224 : index
    %c0_31 = arith.constant 0 : index
    %85 = vector.load %arg3[%c224, %c0_31] : memref<480x128xf32, #tpu.memory_space<vmem>>, vector<64x32xf32>
    %cst_32 = arith.constant dense<0.000000e+00> : vector<8x32xf32>
    %86 = tpu.matmul %17, %85, %cst_32 {dimension_numbers = #tpu.dot_dimension_numbers<[1], [0], [0], [1], [0, 0, 1, 1], [], []>} : vector<8x64xf32>, vector<64x32xf32>, vector<8x32xf32> -> vector<8x32xf32>
    %c7 = arith.constant 7 : index
    %c0_33 = arith.constant 0 : index
    %87 = vector.load %arg4[%c7, %c0_33] : memref<24x128xf32, #tpu.memory_space<vmem>>, vector<1x32xf32>
    %88 = vector.broadcast %87 : vector<1x32xf32> to vector<8x32xf32>
    %89 = arith.addf %86, %88 : vector<8x32xf32>
    %cst_34 = arith.constant dense<0.000000e+00> : vector<8xf32>
    %90 = vector.multi_reduction <add>, %89, %cst_34 [1] : vector<8x32xf32> to vector<8xf32>
    %91 = vector.shape_cast %90 : vector<8xf32> to vector<8x1xf32>
    %cst_35 = arith.constant 3.200000e+01 : f32
    %92 = vector.broadcast %cst_35 : f32 to vector<8x1xf32>
    %93 = arith.divf %91, %92 : vector<8x1xf32>
    %94 = vector.broadcast %93 : vector<8x1xf32> to vector<8x32xf32>
    %95 = arith.subf %89, %94 : vector<8x32xf32>
    %96 = arith.mulf %95, %95 : vector<8x32xf32>
    %cst_36 = arith.constant dense<0.000000e+00> : vector<8xf32>
    %97 = vector.multi_reduction <add>, %96, %cst_36 [1] : vector<8x32xf32> to vector<8xf32>
    %98 = vector.shape_cast %97 : vector<8xf32> to vector<8x1xf32>
    %cst_37 = arith.constant 3.200000e+01 : f32
    %99 = vector.broadcast %cst_37 : f32 to vector<8x1xf32>
    %100 = arith.divf %98, %99 : vector<8x1xf32>
    %101 = vector.broadcast %93 : vector<8x1xf32> to vector<8x32xf32>
    %102 = arith.subf %89, %101 : vector<8x32xf32>
    %cst_38 = arith.constant 9.99999974E-6 : f32
    %103 = vector.broadcast %cst_38 : f32 to vector<8x1xf32>
    %104 = arith.addf %100, %103 : vector<8x1xf32>
    %105 = math.rsqrt %104 : vector<8x1xf32>
    %106 = vector.broadcast %105 : vector<8x1xf32> to vector<8x32xf32>
    %107 = arith.mulf %102, %106 : vector<8x32xf32>
    %c8 = arith.constant 8 : index
    %c0_39 = arith.constant 0 : index
    %108 = vector.load %arg4[%c8, %c0_39] : memref<24x128xf32, #tpu.memory_space<vmem>>, vector<1x32xf32>
    %109 = vector.broadcast %108 : vector<1x32xf32> to vector<8x32xf32>
    %110 = arith.mulf %107, %109 : vector<8x32xf32>
    %c9 = arith.constant 9 : index
    %c0_40 = arith.constant 0 : index
    %111 = vector.load %arg4[%c9, %c0_40] : memref<24x128xf32, #tpu.memory_space<vmem>>, vector<1x32xf32>
    %112 = vector.broadcast %111 : vector<1x32xf32> to vector<8x32xf32>
    %113 = arith.addf %110, %112 : vector<8x32xf32>
    %cst_41 = arith.constant 0.000000e+00 : f32
    %114 = vector.broadcast %cst_41 : f32 to vector<8x32xf32>
    %115 = arith.maximumf %113, %114 : vector<8x32xf32>
    %c288 = arith.constant 288 : index
    %c0_42 = arith.constant 0 : index
    %116 = vector.load %arg3[%c288, %c0_42] : memref<480x128xf32, #tpu.memory_space<vmem>>, vector<32x64xf32>
    %cst_43 = arith.constant dense<0.000000e+00> : vector<8x64xf32>
    %117 = tpu.matmul %84, %116, %cst_43 {dimension_numbers = #tpu.dot_dimension_numbers<[1], [0], [0], [1], [0, 0, 1, 1], [], []>} : vector<8x32xf32>, vector<32x64xf32>, vector<8x64xf32> -> vector<8x64xf32>
    %c320 = arith.constant 320 : index
    %c0_44 = arith.constant 0 : index
    %118 = vector.load %arg3[%c320, %c0_44] : memref<480x128xf32, #tpu.memory_space<vmem>>, vector<32x64xf32>
    %cst_45 = arith.constant dense<0.000000e+00> : vector<8x64xf32>
    %119 = tpu.matmul %115, %118, %cst_45 {dimension_numbers = #tpu.dot_dimension_numbers<[1], [0], [0], [1], [0, 0, 1, 1], [], []>} : vector<8x32xf32>, vector<32x64xf32>, vector<8x64xf32> -> vector<8x64xf32>
    %120 = arith.addf %117, %119 : vector<8x64xf32>
    %c10 = arith.constant 10 : index
    %c0_46 = arith.constant 0 : index
    %121 = vector.load %arg4[%c10, %c0_46] : memref<24x128xf32, #tpu.memory_space<vmem>>, vector<1x64xf32>
    %122 = vector.broadcast %121 : vector<1x64xf32> to vector<8x64xf32>
    %123 = arith.addf %120, %122 : vector<8x64xf32>
    %cst_47 = arith.constant dense<0.000000e+00> : vector<8xf32>
    %124 = vector.multi_reduction <add>, %123, %cst_47 [1] : vector<8x64xf32> to vector<8xf32>
    %125 = vector.shape_cast %124 : vector<8xf32> to vector<8x1xf32>
    %cst_48 = arith.constant 6.400000e+01 : f32
    %126 = vector.broadcast %cst_48 : f32 to vector<8x1xf32>
    %127 = arith.divf %125, %126 : vector<8x1xf32>
    %128 = vector.broadcast %127 : vector<8x1xf32> to vector<8x64xf32>
    %129 = arith.subf %123, %128 : vector<8x64xf32>
    %130 = arith.mulf %129, %129 : vector<8x64xf32>
    %cst_49 = arith.constant dense<0.000000e+00> : vector<8xf32>
    %131 = vector.multi_reduction <add>, %130, %cst_49 [1] : vector<8x64xf32> to vector<8xf32>
    %132 = vector.shape_cast %131 : vector<8xf32> to vector<8x1xf32>
    %cst_50 = arith.constant 6.400000e+01 : f32
    %133 = vector.broadcast %cst_50 : f32 to vector<8x1xf32>
    %134 = arith.divf %132, %133 : vector<8x1xf32>
    %135 = vector.broadcast %127 : vector<8x1xf32> to vector<8x64xf32>
    %136 = arith.subf %123, %135 : vector<8x64xf32>
    %cst_51 = arith.constant 9.99999974E-6 : f32
    %137 = vector.broadcast %cst_51 : f32 to vector<8x1xf32>
    %138 = arith.addf %134, %137 : vector<8x1xf32>
    %139 = math.rsqrt %138 : vector<8x1xf32>
    %140 = vector.broadcast %139 : vector<8x1xf32> to vector<8x64xf32>
    %141 = arith.mulf %136, %140 : vector<8x64xf32>
    %c11 = arith.constant 11 : index
    %c0_52 = arith.constant 0 : index
    %142 = vector.load %arg4[%c11, %c0_52] : memref<24x128xf32, #tpu.memory_space<vmem>>, vector<1x64xf32>
    %143 = vector.broadcast %142 : vector<1x64xf32> to vector<8x64xf32>
    %144 = arith.mulf %141, %143 : vector<8x64xf32>
    %c12 = arith.constant 12 : index
    %c0_53 = arith.constant 0 : index
    %145 = vector.load %arg4[%c12, %c0_53] : memref<24x128xf32, #tpu.memory_space<vmem>>, vector<1x64xf32>
    %146 = vector.broadcast %145 : vector<1x64xf32> to vector<8x64xf32>
    %147 = arith.addf %144, %146 : vector<8x64xf32>
    %cst_54 = arith.constant 0.000000e+00 : f32
    %148 = vector.broadcast %cst_54 : f32 to vector<8x64xf32>
    %149 = arith.maximumf %147, %148 : vector<8x64xf32>
    %c352 = arith.constant 352 : index
    %c0_55 = arith.constant 0 : index
    %150 = vector.load %arg3[%c352, %c0_55] : memref<480x128xf32, #tpu.memory_space<vmem>>, vector<64x64xf32>
    %cst_56 = arith.constant dense<0.000000e+00> : vector<8x64xf32>
    %151 = tpu.matmul %149, %150, %cst_56 {dimension_numbers = #tpu.dot_dimension_numbers<[1], [0], [0], [1], [0, 0, 1, 1], [], []>} : vector<8x64xf32>, vector<64x64xf32>, vector<8x64xf32> -> vector<8x64xf32>
    %c13 = arith.constant 13 : index
    %c0_57 = arith.constant 0 : index
    %152 = vector.load %arg4[%c13, %c0_57] : memref<24x128xf32, #tpu.memory_space<vmem>>, vector<1x64xf32>
    %153 = vector.broadcast %152 : vector<1x64xf32> to vector<8x64xf32>
    %154 = arith.addf %151, %153 : vector<8x64xf32>
    %cst_58 = arith.constant dense<0.000000e+00> : vector<8xf32>
    %155 = vector.multi_reduction <add>, %154, %cst_58 [1] : vector<8x64xf32> to vector<8xf32>
    %156 = vector.shape_cast %155 : vector<8xf32> to vector<8x1xf32>
    %cst_59 = arith.constant 6.400000e+01 : f32
    %157 = vector.broadcast %cst_59 : f32 to vector<8x1xf32>
    %158 = arith.divf %156, %157 : vector<8x1xf32>
    %159 = vector.broadcast %158 : vector<8x1xf32> to vector<8x64xf32>
    %160 = arith.subf %154, %159 : vector<8x64xf32>
    %161 = arith.mulf %160, %160 : vector<8x64xf32>
    %cst_60 = arith.constant dense<0.000000e+00> : vector<8xf32>
    %162 = vector.multi_reduction <add>, %161, %cst_60 [1] : vector<8x64xf32> to vector<8xf32>
    %163 = vector.shape_cast %162 : vector<8xf32> to vector<8x1xf32>
    %cst_61 = arith.constant 6.400000e+01 : f32
    %164 = vector.broadcast %cst_61 : f32 to vector<8x1xf32>
    %165 = arith.divf %163, %164 : vector<8x1xf32>
    %166 = vector.broadcast %158 : vector<8x1xf32> to vector<8x64xf32>
    %167 = arith.subf %154, %166 : vector<8x64xf32>
    %cst_62 = arith.constant 9.99999974E-6 : f32
    %168 = vector.broadcast %cst_62 : f32 to vector<8x1xf32>
    %169 = arith.addf %165, %168 : vector<8x1xf32>
    %170 = math.rsqrt %169 : vector<8x1xf32>
    %171 = vector.broadcast %170 : vector<8x1xf32> to vector<8x64xf32>
    %172 = arith.mulf %167, %171 : vector<8x64xf32>
    %c14 = arith.constant 14 : index
    %c0_63 = arith.constant 0 : index
    %173 = vector.load %arg4[%c14, %c0_63] : memref<24x128xf32, #tpu.memory_space<vmem>>, vector<1x64xf32>
    %174 = vector.broadcast %173 : vector<1x64xf32> to vector<8x64xf32>
    %175 = arith.mulf %172, %174 : vector<8x64xf32>
    %c15 = arith.constant 15 : index
    %c0_64 = arith.constant 0 : index
    %176 = vector.load %arg4[%c15, %c0_64] : memref<24x128xf32, #tpu.memory_space<vmem>>, vector<1x64xf32>
    %177 = vector.broadcast %176 : vector<1x64xf32> to vector<8x64xf32>
    %178 = arith.addf %175, %177 : vector<8x64xf32>
    %cst_65 = arith.constant 0.000000e+00 : f32
    %179 = vector.broadcast %cst_65 : f32 to vector<8x64xf32>
    %180 = arith.maximumf %178, %179 : vector<8x64xf32>
    %c416 = arith.constant 416 : index
    %c0_66 = arith.constant 0 : index
    %181 = vector.load %arg3[%c416, %c0_66] : memref<480x128xf32, #tpu.memory_space<vmem>>, vector<64x16xf32>
    %cst_67 = arith.constant dense<0.000000e+00> : vector<8x16xf32>
    %182 = tpu.matmul %180, %181, %cst_67 {dimension_numbers = #tpu.dot_dimension_numbers<[1], [0], [0], [1], [0, 0, 1, 1], [], []>} : vector<8x64xf32>, vector<64x16xf32>, vector<8x16xf32> -> vector<8x16xf32>
    %c16 = arith.constant 16 : index
    %c0_68 = arith.constant 0 : index
    %183 = vector.load %arg4[%c16, %c0_68] : memref<24x128xf32, #tpu.memory_space<vmem>>, vector<1x16xf32>
    %184 = vector.broadcast %183 : vector<1x16xf32> to vector<8x16xf32>
    %185 = arith.addf %182, %184 : vector<8x16xf32>
    %186 = tpu.iota {dimensions = array<i32: 1>} : vector<8x16xi32>
    %c15_i32 = arith.constant 15 : i32
    %187 = vector.broadcast %c15_i32 : i32 to vector<8x16xi32>
    %188 = arith.cmpi eq, %186, %187 : vector<8x16xi32>
    %189 = math.tanh %185 : vector<8x16xf32>
    %190 = arith.select %188, %189, %185 : vector<8x16xi1>, vector<8x16xf32>
    %c0_69 = arith.constant 0 : index
    %c0_70 = arith.constant 0 : index
    %191 = vector.load %arg5[%c0_69, %c0_70] : memref<8x16xf32, #tpu.memory_space<vmem>>, vector<8x16xf32>
    tpu.vector_store %arg5[%c0_69, %c0_70], %190 {strides = array<i32>} : memref<8x16xf32, #tpu.memory_space<vmem>>, vector<8x16xf32>,
    return
  }
}

</mosaic_0001>

<bundles_post_ra>
// kernel: fwd.1
= control target key start
LH: loop header
LB: loop body
LE: loop exit
PB: predicated region body
PF: predicated region fallthrough
CT: control target
= control target key end

     0   :  { %10 = vsyncpa [#allocation3], 0  ;;  %s1253_s18 = smov [#allocation2]   ;;  %s1437_s0 = inlined_call_operand.vmem [shape: s32[8,8], index: 0, kind: input, shape index: {}]   ;;  %s1438_s1 = inlined_call_operand.vmem [shape: f32[8,32], index: 1, kind: input, shape index: {}]   ;;  %s1439_s2 = inlined_call_operand.vmem [shape: f32[8,64], index: 2, kind: input, shape index: {}]   ;;  %s1440_s3 = inlined_call_operand.hbm [shape: f32[480,128], index: 3, kind: input, shape index: {}]   ;;  %s1441_s4 = inlined_call_operand.vmem [shape: f32[24,128], index: 4, kind: input, shape index: {}]   ;;  %s1442_s5 = inlined_call_operand.vmem [shape: f32[8,16], index: 5, kind: output, shape index: {}]  }
   0x1   :  { %s22_s19 = sshll.u32 %s1253_s18, 4  ;;  %s1229_s22 = scalar_lea.hbm %s1440_s3, 7680  ;;  %s23_s19 = int_to_ptr.vmem [resolvable:$true] %s22_s19 }
   0x2   :  { %p1230_p0 = scmp.ne.s32.totalorder %s1440_s3, %s1229_s22  ;;  %p1233_p1 = scmp.lt.u32.totalorder %s1229_s22, %s1440_s3 }
   0x4   :  { %p1235_p2 = pnand %p1233_p1, %p1230_p0 }
   0x6   :  { %1238 = shalt.err (!%p1235_p2)
}
   0x7   :  { %s1239_s27 = scalar_lea.vmem %s23_s19, 7680  ;;  %p1244_p4 = scmp.lt.s32.totalorder %s23_s19, %s23_s19 }
   0x8   :  { %p1240_p3 = scmp.ne.s32.totalorder %s23_s19, %s1239_s27  ;;  %p1245_p5 = scmp.lt.s32.totalorder %s1239_s27, %s1239_s27 }
   0xa   :  { %p1246_p6 = por %p1245_p5, %p1244_p4 }
   0xc   :  { %p1247_p7 = pnand %p1246_p6, %p1240_p3 }
   0xe   :  { %1250 = shalt.err (!%p1247_p7)
}
   0xf   :  { %s1254_s28 = smov 128   ;;  %s1255_s29 = smov 8  }
  0x10   :  { %28 = dma.hbm_to_vmem [thread:$0]  %s1440_s3, 7680, %s23_s19, [#allocation3], %s1254_s28, %s1254_s28, %s1255_s29  }
  0x11   :  { %1251 = dma.done.wait [#allocation3], 7680  }
  0x12   :  { %1252 = vsyncadd [#allocation3], 4294959616  ;;  %v1256_v0 = vmov 0   ;;  %v1257_v1 = vmov 2   ;;  %v34_v2 = vld [vmem:[%s1437_s0] sm:$0xff]  ;;  %v57_v4 = vld [vmem:[#allocation2 + $0x8] sm:$0xff]  ;;  %v35_v33 = vlaneseq }
  0x13   :  { %1213 = vset.pattern.permute.xlu0 %v1256_v0  ;;  %1215 = vset.pattern.permute.xlu1 %v1257_v1  ;;  %v56_v3 = vld [vmem:[#allocation2] sm:$0xff]  ;;  %v1258_v5 = vmov 0.0|0.0   ;;  %v1259_v7 = vmov 1   ;;  %v58_v8 = vld [vmem:[#allocation2 + $0x10] sm:$0xff]  ;;  %v59_v9 = vld [vmem:[#allocation2 + $0x18] sm:$0xff]  ;;  %vm1260_vm0 = vmmov 0  }
  0x14   :  { %38 = vperm.xlu0 %1213, %v34_v2   ;;  %47 = vperm.xlu1 %1215, %v34_v2   ;;  %v1115_v6 = vpack.c.bf16 %v57_v4, %v56_v3  ;;  %v1118_v10 = vpack.c.bf16 %v59_v9, %v58_v8  ;;  %v1261_v11 = vmov 0.0   ;;  %v139_v12 = vld [vmem:[#allocation2 + $0x20] sm:$0xff]  ;;  %v140_v13 = vld [vmem:[#allocation2 + $0x28] sm:$0xff]  ;;  %v141_v14 = vld [vmem:[#allocation2 + $0x30] sm:$0xff]  ;;  %v1322_v35 = vand.u32 127, %v35_v33 }
  0x15   :  { %1114 = vmatprep.subr.bf16.mxu0 %v1258_v5  ;;  %1120 = vmatprep.subr.bf16.mxu1 %v1258_v5  ;;  %v1121_v15 = vpack.c.bf16 %v140_v13, %v139_v12  ;;  %v142_v16 = vld [vmem:[#allocation2 + $0x38] sm:$0xff]  ;;  %v143_v18 = vld [vmem:[#allocation2 + $0x40] sm:$0xff]  ;;  %v144_v19 = vld [vmem:[#allocation2 + $0x48] sm:$0xff]  ;;  %vm65_vm6 = vcmask 261120   ;;  %vm230_vm7 = vcmask 523264   ;;  %vm870_vm9 = vcmask 130048  }
  0x16   :  { %1116 = vmatpush3.bf16.msra.mxu0 %v1115_v6  ;;  %978 = vmatprep.mubr.msk.f32.mxu0 %vm1260_vm0, %v1261_v11  ;;  %v1124_v17 = vpack.c.bf16 %v142_v16, %v141_v14  ;;  %v1127_v20 = vpack.c.bf16 %v144_v19, %v143_v18  ;;  %v145_v21 = vld [vmem:[#allocation2 + $0x50] sm:$0xff]  ;;  %v146_v22 = vld [vmem:[#allocation2 + $0x58] sm:$0xff]  ;;  %v147_v24 = vld [vmem:[#allocation2 + $0x60] sm:$0xff]  ;;  %vm867_vm8 = vcmp.eq.s32.totalorder %v1322_v35, 15 }
  0x17   :  { %1117 = vmatprep.subr.bf16.mxu0 %v1258_v5  ;;  %1013 = vmatprep.mubr.msk.f32.mxu1 %vm1260_vm0, %v1261_v11  ;;  %v1130_v23 = vpack.c.bf16 %v146_v22, %v145_v21  ;;  %v148_v25 = vld [vmem:[#allocation2 + $0x68] sm:$0xff]  ;;  %v149_v27 = vld [vmem:[#allocation2 + $0x70] sm:$0xff]  ;;  %v150_v28 = vld [vmem:[#allocation2 + $0x78] sm:$0xff] }
  0x18   :  { %1214 = vset.pattern.permute.xlu0 %v1259_v7  ;;  %1122 = vmatpush3.bf16.msra.mxu1 %v1121_v15  ;;  %v1133_v26 = vpack.c.bf16 %v148_v25, %v147_v24  ;;  %v1136_v29 = vpack.c.bf16 %v150_v28, %v149_v27  ;;  %v151_v30 = vld [vmem:[#allocation2 + $0x80] sm:$0xff]  ;;  %v152_v31 = vld [vmem:[#allocation2 + $0x88] sm:$0xff]  ;;  %v153_v41 = vld [vmem:[#allocation2 + $0x90] sm:$0xff] }
  0x19   :  { %42 = vperm.xlu0 %1214, %v34_v2   ;;  %1123 = vmatprep.subr.bf16.mxu1 %v1258_v5  ;;  %v1139_v32 = vpack.c.bf16 %v152_v31, %v151_v30  ;;  %v53_v38 = vld [vmem:[%s1438_s1] sm:$0xff]  ;;  %v154_v42 = vld [vmem:[#allocation2 + $0x98] sm:$0xff]  ;;  %v259_v59 = vld [vmem:[#allocation2 + $0xa8] sm:$0xff] }
  0x1a   :  { %1119 = vmatpush3.bf16.msra.mxu0 %v1118_v10  ;;  %v1142_v43 = vpack.c.bf16 %v154_v42, %v153_v41  ;;  %v878_v44 = vld [vmem:[%s1441_s4] ss:$0 sm:$0xff]  ;;  %v880_v48 = vld [vmem:[%s1441_s4 + $0x1] ss:$0 sm:$0xff]  ;;  %v260_v61 = vld [vmem:[#allocation2 + $0xb0] sm:$0xff] }
  0x1b   :  { %1144 = vmatprep.subr.bf16.mxu0 %v1258_v5  ;;  %v258_v58 = vld [vmem:[#allocation2 + $0xa0] sm:$0xff]  ;;  %v261_v62 = vld [vmem:[#allocation2 + $0xb8] sm:$0xff]  ;;  %v264_v3 = vld [vmem:[#allocation2 + $0xd0] sm:$0xff] }
  0x1c   :  { %1125 = vmatpush3.bf16.msra.mxu1 %v1124_v17  ;;  %v1145_v60 = vpack.c.bf16 %v259_v59, %v258_v58  ;;  %v1148_v63 = vpack.c.bf16 %v261_v62, %v260_v61  ;;  %v262_v0 = vld [vmem:[#allocation2 + $0xc0] sm:$0xff]  ;;  %v265_v4 = vld [vmem:[#allocation2 + $0xd8] sm:$0xff]  ;;  %v372_v17 = vld [vmem:[#allocation2 + $0xe8] sm:$0xff] }
  0x1d   :  { %1216 = vset.pattern.permute.xlu0 %v1257_v1  ;;  %1126 = vmatprep.subr.bf16.mxu1 %v1258_v5  ;;  %v263_v1 = vld [vmem:[#allocation2 + $0xc8] sm:$0xff]  ;;  %v1154_v6 = vpack.c.bf16 %v265_v4, %v264_v3  ;;  %v881_v12 = vld [vmem:[%s1441_s4 + $0x2] ss:$0 sm:$0xff]  ;;  %v882_v14 = vld [vmem:[%s1441_s4 + $0x3] ss:$0 sm:$0xff] }
  0x1e   :  { %v1151_v2 = vpack.c.bf16 %v263_v1, %v262_v0  ;;  %v371_v16 = vld [vmem:[#allocation2 + $0xe0] sm:$0xff]  ;;  %v373_v21 = vld [vmem:[#allocation2 + $0xf0] sm:$0xff]  ;;  %v374_v22 = vld [vmem:[#allocation2 + $0xf8] sm:$0xff] }
  0x1f   :  { %v1157_v19 = vpack.c.bf16 %v372_v17, %v371_v16  ;;  %v375_v24 = vld [vmem:[#allocation2 + $0x100] sm:$0xff]  ;;  %v376_v25 = vld [vmem:[#allocation2 + $0x108] sm:$0xff]  ;;  %v377_v27 = vld [vmem:[#allocation2 + $0x110] sm:$0xff] }
  0x20   :  { %1128 = vmatpush3.bf16.msra.mxu1 %v1127_v20  ;;  %v378_v28 = vld [vmem:[#allocation2 + $0x118] sm:$0xff]  ;;  %v55_v30 = vld [vmem:[%s1439_s2] sm:$0xff]  ;;  %v488_v59 = vld [vmem:[#allocation2 + $0x148] sm:$0xff] }
  0x21   :  { %1129 = vmatprep.subr.bf16.mxu1 %v1258_v5  ;;  %v883_v31 = vld [vmem:[%s1441_s4 + $0x4] ss:$0 sm:$0xff]  ;;  %v489_v61 = vld [vmem:[#allocation2 + $0x150] sm:$0xff]  ;;  %v490_v62 = vld [vmem:[#allocation2 + $0x158] sm:$0xff] }
  0x22   :  { %v487_v58 = vld [vmem:[#allocation2 + $0x140] sm:$0xff]  ;;  %v889_v16 = vld [vmem:[%s1441_s4 + $0x8] ss:$0 sm:$0xff] }
  0x23   :  { %v885_v4 = vld [vmem:[%s1441_s4 + $0x5] ss:$0 sm:$0xff] }
  0x24   :  { %1131 = vmatpush3.bf16.msra.mxu1 %v1130_v23  ;;  %v1160_v23 = vpack.c.bf16 %v374_v22, %v373_v21 }
  0x25   :  { %1132 = vmatprep.subr.bf16.mxu1 %v1258_v5 }
  0x28   :  { %1134 = vmatpush3.bf16.msra.mxu1 %v1133_v26  ;;  %v1163_v26 = vpack.c.bf16 %v376_v25, %v375_v24  ;;  %v893_v25 = vld [vmem:[%s1441_s4 + $0xa] ss:$0 sm:$0xff] }
  0x29   :  { %1135 = vmatprep.subr.bf16.mxu1 %v1258_v5 }
  0x2c   :  { %1137 = vmatpush3.bf16.msra.mxu1 %v1136_v29  ;;  %v1166_v29 = vpack.c.bf16 %v378_v28, %v377_v27 }
  0x2d   :  { %1138 = vmatprep.subr.bf16.mxu1 %v1258_v5 }
  0x30   :  { %1140 = vmatpush3.bf16.msra.mxu1 %v1139_v32 }
  0x31   :  { %1141 = vmatprep.subr.bf16.mxu1 %v1258_v5 }
  0x34   :  { %1143 = vmatpush3.bf16.msra.mxu1 %v1142_v43 }
  0x35   :  { %1168 = vmatprep.subr.bf16.mxu1 %v1258_v5 }
  0x93   :  { %v39_v34 = vpop.permute.xlu0 %38  ;;  %v48_v36 = vpop.permute.xlu1 %47 }
  0x94   :  { %vm49_vm1 = vcmp.eq.s32.totalorder %v1322_v35, %v48_v36  ;;  %vm40_vm2 = vcmp.eq.s32.totalorder %v1322_v35, %v39_v34 }
  0x98   :  { %v43_v37 = vpop.permute.xlu0 %42 }
  0x99   :  { %vm44_vm3 = vcmp.eq.s32.totalorder %v1322_v35, %v43_v37  ;;  %v887_v37 = vld [vmem:[%s1441_s4 + $0x7] ss:$0 sm:$0xff] }
  0x9a   :  { %vm45_vm4 = vmor %vm40_vm2, %vm44_vm3 }
  0x9b   :  { %vm50_vm5 = vmor %vm45_vm4, %vm49_vm1 }
  0x9c   :  { %v877_v39 = vsel %vm50_vm5, 1.0, %v1261_v11 }
  0x9d   :  { %v54_v40 = vadd.f32 %v877_v39, %v53_v38 }
  0x9f   :  { %979 = vmatmul.mubr.msk.f32.vlgmr.msra.gmra.mrb[0].mxu0 %vm65_vm6, %v54_v40 }
  0xa0   :  { %1032 = vmatprep.mubr.msk.f32.mxu0 %vm1260_vm0, %v1261_v11  ;;  %1146 = vmatpush3.bf16.msra.mxu0 %v1145_v60  ;;  %v1169_v60 = vpack.c.bf16 %v488_v59, %v487_v58 }
  0xa1   :  { %1147 = vmatprep.subr.bf16.mxu0 %v1258_v5 }
  0xa4   :  { %1149 = vmatpush3.bf16.msra.mxu0 %v1148_v63  ;;  %v1172_v63 = vpack.c.bf16 %v490_v62, %v489_v61 }
  0xa5   :  { %1150 = vmatprep.subr.bf16.mxu0 %v1258_v5 }
  0xa8   :  { %1152 = vmatpush3.bf16.msra.mxu0 %v1151_v2 }
  0xa9   :  { %1153 = vmatprep.subr.bf16.mxu0 %v1258_v5 }
  0xac   :  { %1155 = vmatpush3.bf16.msra.mxu0 %v1154_v6 }
  0xad   :  { %1156 = vmatprep.subr.bf16.mxu0 %v1258_v5 }
 0x172   :  { %v135_v45 = vpop.f32.mrb[0].mxu0 }
 0x173   :  { %v136_v46 = vadd.f32 %v878_v44, %v135_v45  ;;  %v980_v47 = vpop.f32.mrb[1].mxu0 }
 0x175   :  { %1014 = vmatmul.mubr.f32.vlgmr.msra.gmra.mrb[0].mxu1 %v136_v46 }
 0x176   :  { %1062 = vmatprep.mubr.msk.f32.mxu1 %vm1260_vm0, %v1261_v11  ;;  %1170 = vmatpush3.bf16.msra.mxu1 %v1169_v60 }
 0x177   :  { %1171 = vmatprep.subr.bf16.mxu1 %v1258_v5 }
 0x17a   :  { %1173 = vmatpush3.bf16.msra.mxu1 %v1172_v63 }
 0x17b   :  { %1180 = vmatprep.subr.bf16.mxu1 %v1258_v5 }
 0x248   :  { %v226_v49 = vpop.f32.mrb[0].mxu1 }
 0x249   :  { %v227_v50 = vadd.f32 %v880_v48, %v226_v49  ;;  %v1015_v51 = vpop.f32.mrb[1].mxu1 }
 0x24b   :  { %v231_v52 = vsel %vm230_vm7, %v227_v50, 0.0 }
 0x24c   :  { %232 = vadd.xlane.f32.xlu1 %v231_v52  ;;  %v483_v52 = vld [vmem:[#allocation2 + $0x120] sm:$0xff] }
 0x2d9   :  { %v233_v53 = vpop.xlane.xlu1 %232 }
 0x2da   :  { %v235_v54 = vmul.f32 0.015625, %v233_v53  ;;  %v484_v53 = vld [vmem:[#allocation2 + $0x128] sm:$0xff] }
 0x2dc   :  { %v236_v55 = vsub.f32 %v227_v50, %v235_v54  ;;  %v1175_v54 = vpack.c.bf16 %v484_v53, %v483_v52  ;;  %v895_v53 = vld [vmem:[%s1441_s4 + $0xc] ss:$0 sm:$0xff] }
 0x2de   :  { %v237_v56 = vmul.f32 %v236_v55, %v236_v55 }
 0x2e0   :  { %v238_v57 = vsel %vm230_vm7, %v237_v56, 0.0  ;;  %v486_v56 = vld [vmem:[#allocation2 + $0x138] sm:$0xff] }
 0x2e1   :  { %239 = vadd.xlane.f32.xlu0 %v238_v57 }
 0x36e   :  { %v240_v7 = vpop.xlane.xlu0 %239 }
 0x36f   :  { %v241_v8 = vmul.f32 0.015625, %v240_v7 }
 0x371   :  { %v242_v9 = vadd.f32 1e-05, %v241_v8 }
 0x373   :  { %1217 = vrsqrt.f32 %v242_v9  ;;  %v886_v9 = vld [vmem:[%s1441_s4 + $0x6] ss:$0 sm:$0xff] }
 0x37d   :  { %v1218_v10 = vpop.eup %1217 }
 0x37e   :  { %v244_v13 = vmul.f32 %v1218_v10, %v236_v55  ;;  %v485_v55 = vld [vmem:[#allocation2 + $0x130] sm:$0xff] }
 0x37f   :  { %v1178_v57 = vpack.c.bf16 %v486_v56, %v485_v55 }
 0x380   :  { %v250_v15 = vmul.f32 %v881_v12, %v244_v13 }
 0x382   :  { %v256_v18 = vadd.f32 %v882_v14, %v250_v15 }
 0x384   :  { %v257_v20 = vmax.f32 %v256_v18, 0.0  ;;  %v890_v18 = vld [vmem:[%s1441_s4 + $0x9] ss:$0 sm:$0xff] }
 0x386   :  { %1033 = vmatmul.mubr.msk.f32.vlgmr.msra.gmra.mrb[2].mxu0 %vm230_vm7, %v257_v20 }
 0x387   :  { %1158 = vmatpush3.bf16.msra.mxu0 %v1157_v19  ;;  %1051 = vmatprep.mubr.msk.f32.mxu0 %vm1260_vm0, %v1261_v11 }
 0x388   :  { %1159 = vmatprep.subr.bf16.mxu0 %v1258_v5 }
 0x38b   :  { %1161 = vmatpush3.bf16.msra.mxu0 %v1160_v23 }
 0x38c   :  { %1162 = vmatprep.subr.bf16.mxu0 %v1258_v5 }
 0x38f   :  { %1164 = vmatpush3.bf16.msra.mxu0 %v1163_v26 }
 0x390   :  { %1165 = vmatprep.subr.bf16.mxu0 %v1258_v5 }
 0x393   :  { %1167 = vmatpush3.bf16.msra.mxu0 %v1166_v29 }
 0x394   :  { %1174 = vmatprep.subr.bf16.mxu0 %v1258_v5 }
 0x396   :  { %1052 = vmatmul.mubr.msk.f32.vlgmr.msra.gmra.mrb[4].mxu0 %vm230_vm7, %v55_v30 }
 0x397   :  { %1073 = vmatprep.mubr.msk.f32.mxu0 %vm1260_vm0, %v1261_v11  ;;  %1176 = vmatpush3.bf16.msra.mxu0 %v1175_v54 }
 0x398   :  { %1177 = vmatprep.subr.bf16.mxu0 %v1258_v5 }
 0x39b   :  { %1179 = vmatpush3.bf16.msra.mxu0 %v1178_v57  ;;  %v896_v57 = vld [vmem:[%s1441_s4 + $0xd] ss:$0 sm:$0xff] }
 0x39c   :  { %1192 = vmatprep.subr.bf16.mxu0 %v1258_v5 }
 0x459   :  { %v340_v32 = vpop.f32.mrb[2].mxu0 }
 0x45a   :  { %v341_v33 = vadd.f32 %v883_v31, %v340_v32  ;;  %v1034_v34 = vpop.f32.mrb[3].mxu0 }
 0x45c   :  { %v344_v36 = vsel %vm65_vm6, %v341_v33, 0.0 }
 0x45d   :  { %345 = vadd.xlane.f32.xlu1 %v344_v36  ;;  %v670_v36 = vld [vmem:[#allocation2 + $0x168] sm:$0xff] }
 0x469   :  { %v453_v38 = vpop.f32.mrb[4].mxu0 }
 0x46a   :  { %v454_v39 = vadd.f32 %v887_v37, %v453_v38  ;;  %v1053_v40 = vpop.f32.mrb[5].mxu0  ;;  %v671_v38 = vld [vmem:[#allocation2 + $0x170] sm:$0xff] }
 0x46c   :  { %v457_v41 = vsel %vm65_vm6, %v454_v39, 0.0 }
 0x46d   :  { %458 = vadd.xlane.f32.xlu0 %v457_v41  ;;  %v673_v41 = vld [vmem:[#allocation2 + $0x180] sm:$0xff] }
 0x4ea   :  { %v346_v42 = vpop.xlane.xlu1 %345 }
 0x4eb   :  { %v348_v43 = vmul.f32 0.03125, %v346_v42  ;;  %v674_v42 = vld [vmem:[#allocation2 + $0x188] sm:$0xff] }
 0x4ed   :  { %v349_v44 = vsub.f32 %v341_v33, %v348_v43  ;;  %v1187_v43 = vpack.c.bf16 %v674_v42, %v673_v41 }
 0x4ef   :  { %v350_v45 = vmul.f32 %v349_v44, %v349_v44 }
 0x4f1   :  { %v351_v46 = vsel %vm65_vm6, %v350_v45, 0.0  ;;  %v676_v45 = vld [vmem:[#allocation2 + $0x198] sm:$0xff] }
 0x4f2   :  { %352 = vadd.xlane.f32.xlu1 %v351_v46 }
 0x4fa   :  { %v459_v47 = vpop.xlane.xlu0 %458 }
 0x4fb   :  { %v460_v48 = vmul.f32 0.03125, %v459_v47 }
 0x4fd   :  { %v461_v49 = vsub.f32 %v454_v39, %v460_v48  ;;  %v672_v39 = vld [vmem:[#allocation2 + $0x178] sm:$0xff] }
 0x4fe   :  { %v1184_v40 = vpack.c.bf16 %v672_v39, %v671_v38 }
 0x4ff   :  { %v462_v50 = vmul.f32 %v461_v49, %v461_v49 }
 0x501   :  { %v463_v51 = vsel %vm65_vm6, %v462_v50, 0.0 }
 0x502   :  { %464 = vadd.xlane.f32.xlu0 %v463_v51  ;;  %v894_v51 = vld [vmem:[%s1441_s4 + $0xb] ss:$0 sm:$0xff] }
 0x57f   :  { %v353_v0 = vpop.xlane.xlu1 %352 }
 0x580   :  { %v354_v1 = vmul.f32 0.03125, %v353_v0 }
 0x582   :  { %v355_v2 = vadd.f32 1e-05, %v354_v1 }
 0x584   :  { %1219 = vrsqrt.f32 %v355_v2 }
 0x58e   :  { %v1220_v3 = vpop.eup %1219 }
 0x58f   :  { %v357_v6 = vmul.f32 %v1220_v3, %v349_v44  ;;  %v465_v7 = vpop.xlane.xlu0 %464  ;;  %v675_v44 = vld [vmem:[#allocation2 + $0x190] sm:$0xff]  ;;  %v781_v3 = vld [vmem:[#allocation2 + $0x1a0] sm:$0xff] }
 0x590   :  { %v466_v8 = vmul.f32 0.03125, %v465_v7  ;;  %v1190_v46 = vpack.c.bf16 %v676_v45, %v675_v44  ;;  %v783_v7 = vld [vmem:[#allocation2 + $0x1b0] sm:$0xff] }
 0x591   :  { %v363_v10 = vmul.f32 %v885_v4, %v357_v6  ;;  %v782_v4 = vld [vmem:[#allocation2 + $0x1a8] sm:$0xff] }
 0x592   :  { %v467_v12 = vadd.f32 1e-05, %v466_v8  ;;  %v1193_v6 = vpack.c.bf16 %v782_v4, %v781_v3  ;;  %v784_v8 = vld [vmem:[#allocation2 + $0x1b8] sm:$0xff] }
 0x593   :  { %v369_v13 = vadd.f32 %v886_v9, %v363_v10  ;;  %v1196_v9 = vpack.c.bf16 %v784_v8, %v783_v7  ;;  %v785_v10 = vld [vmem:[#allocation2 + $0x1c0] sm:$0xff] }
 0x594   :  { %1221 = vrsqrt.f32 %v467_v12  ;;  %v786_v12 = vld [vmem:[#allocation2 + $0x1c8] sm:$0xff] }
 0x595   :  { %v370_v14 = vmax.f32 %v369_v13, 0.0  ;;  %v1199_v13 = vpack.c.bf16 %v786_v12, %v785_v10 }
 0x597   :  { %1074 = vmatmul.mubr.msk.f32.vlgmr.msra.gmra.mrb[6].mxu0 %vm65_vm6, %v370_v14  ;;  %v787_v14 = vld [vmem:[#allocation2 + $0x1d0] sm:$0xff] }
 0x598   :  { %1111 = vmatprep.mubr.msk.f32.mxu0 %vm1260_vm0, %v1261_v11  ;;  %1194 = vmatpush3.bf16.msra.mxu0 %v1193_v6 }
 0x599   :  { %1195 = vmatprep.subr.bf16.mxu0 %v1258_v5 }
 0x59c   :  { %1197 = vmatpush3.bf16.msra.mxu0 %v1196_v9 }
 0x59d   :  { %1198 = vmatprep.subr.bf16.mxu0 %v1258_v5 }
 0x59e   :  { %v1222_v15 = vpop.eup %1221 }
 0x59f   :  { %v469_v17 = vmul.f32 %v1222_v15, %v461_v49  ;;  %v788_v15 = vld [vmem:[#allocation2 + $0x1d8] sm:$0xff] }
 0x5a0   :  { %1200 = vmatpush3.bf16.msra.mxu0 %v1199_v13 }
 0x5a1   :  { %v475_v19 = vmul.f32 %v889_v16, %v469_v17  ;;  %1201 = vmatprep.subr.bf16.mxu0 %v1258_v5  ;;  %v1202_v16 = vpack.c.bf16 %v788_v15, %v787_v14 }
 0x5a3   :  { %v481_v20 = vadd.f32 %v890_v18, %v475_v19 }
 0x5a4   :  { %1203 = vmatpush3.bf16.msra.mxu0 %v1202_v16 }
 0x5a5   :  { %v482_v21 = vmax.f32 %v481_v20, 0.0 }
 0x5a7   :  { %1063 = vmatmul.mubr.msk.f32.vlgmr.msra.gmra.mrb[2].mxu1 %vm65_vm6, %v482_v21  ;;  %v898_v21 = vld [vmem:[%s1441_s4 + $0xe] ss:$0 sm:$0xff] }
 0x5a8   :  { %1092 = vmatprep.mubr.msk.f32.mxu1 %vm1260_vm0, %v1261_v11  ;;  %v669_v11 = vld [vmem:[#allocation2 + $0x160] sm:$0xff] }
 0x5a9   :  { %v1181_v37 = vpack.c.bf16 %v670_v36, %v669_v11 }
 0x5ab   :  { %1182 = vmatpush3.bf16.msra.mxu1 %v1181_v37 }
 0x5ac   :  { %1183 = vmatprep.subr.bf16.mxu1 %v1258_v5 }
 0x5af   :  { %1185 = vmatpush3.bf16.msra.mxu1 %v1184_v40 }
 0x5b0   :  { %1186 = vmatprep.subr.bf16.mxu1 %v1258_v5 }
 0x5b3   :  { %1188 = vmatpush3.bf16.msra.mxu1 %v1187_v43 }
 0x5b4   :  { %1189 = vmatprep.subr.bf16.mxu1 %v1258_v5 }
 0x5b7   :  { %1191 = vmatpush3.bf16.msra.mxu1 %v1190_v46 }
 0x66a   :  { %v633_v22 = vpop.f32.mrb[6].mxu0 }
 0x66b   :  { %v1075_v23 = vpop.f32.mrb[7].mxu0 }
 0x66c   :  { %v899_v23 = vld [vmem:[%s1441_s4 + $0xf] ss:$0 sm:$0xff] }
 0x67a   :  { %v560_v24 = vpop.f32.mrb[2].mxu1 }
 0x67b   :  { %v634_v26 = vadd.f32 %v633_v22, %v560_v24  ;;  %v1064_v27 = vpop.f32.mrb[3].mxu1 }
 0x67d   :  { %v642_v28 = vadd.f32 %v893_v25, %v634_v26  ;;  %v900_v26 = vld [vmem:[%s1441_s4 + $0x10] ss:$0 sm:$0xff] }
 0x67f   :  { %v643_v29 = vsel %vm230_vm7, %v642_v28, 0.0 }
 0x680   :  { %644 = vadd.xlane.f32.xlu1 %v643_v29 }
 0x70d   :  { %v645_v30 = vpop.xlane.xlu1 %644 }
 0x70e   :  { %v646_v31 = vmul.f32 0.015625, %v645_v30 }
 0x710   :  { %v647_v32 = vsub.f32 %v642_v28, %v646_v31 }
 0x712   :  { %v648_v33 = vmul.f32 %v647_v32, %v647_v32 }
 0x714   :  { %v649_v34 = vsel %vm230_vm7, %v648_v33, 0.0 }
 0x715   :  { %650 = vadd.xlane.f32.xlu0 %v649_v34 }
 0x7a2   :  { %v651_v47 = vpop.xlane.xlu0 %650 }
 0x7a3   :  { %v652_v48 = vmul.f32 0.015625, %v651_v47 }
 0x7a5   :  { %v653_v49 = vadd.f32 1e-05, %v652_v48 }
 0x7a7   :  { %1223 = vrsqrt.f32 %v653_v49 }
 0x7b1   :  { %v1224_v50 = vpop.eup %1223 }
 0x7b2   :  { %v655_v52 = vmul.f32 %v1224_v50, %v647_v32 }
 0x7b4   :  { %v661_v54 = vmul.f32 %v894_v51, %v655_v52 }
 0x7b6   :  { %v667_v55 = vadd.f32 %v895_v53, %v661_v54 }
 0x7b8   :  { %v668_v56 = vmax.f32 %v667_v55, 0.0 }
 0x7ba   :  { %1093 = vmatmul.mubr.msk.f32.vlgmr.msra.gmra.mrb[4].mxu1 %vm230_vm7, %v668_v56 }
 0x88d   :  { %v751_v58 = vpop.f32.mrb[4].mxu1 }
 0x88e   :  { %v752_v59 = vadd.f32 %v896_v57, %v751_v58  ;;  %v1094_v60 = vpop.f32.mrb[5].mxu1 }
 0x890   :  { %v755_v61 = vsel %vm230_vm7, %v752_v59, 0.0 }
 0x891   :  { %756 = vadd.xlane.f32.xlu1 %v755_v61 }
 0x91e   :  { %v757_v62 = vpop.xlane.xlu1 %756 }
 0x91f   :  { %v758_v63 = vmul.f32 0.015625, %v757_v62 }
 0x921   :  { %v759_v0 = vsub.f32 %v752_v59, %v758_v63 }
 0x923   :  { %v760_v1 = vmul.f32 %v759_v0, %v759_v0 }
 0x925   :  { %v761_v2 = vsel %vm230_vm7, %v760_v1, 0.0 }
 0x926   :  { %762 = vadd.xlane.f32.xlu0 %v761_v2 }
 0x9b3   :  { %v763_v17 = vpop.xlane.xlu0 %762 }
 0x9b4   :  { %v764_v18 = vmul.f32 0.015625, %v763_v17 }
 0x9b6   :  { %v765_v19 = vadd.f32 1e-05, %v764_v18 }
 0x9b8   :  { %1225 = vrsqrt.f32 %v765_v19 }
 0x9c2   :  { %v1226_v20 = vpop.eup %1225 }
 0x9c3   :  { %v767_v22 = vmul.f32 %v1226_v20, %v759_v0 }
 0x9c5   :  { %v773_v24 = vmul.f32 %v898_v21, %v767_v22 }
 0x9c7   :  { %v779_v5 = vadd.f32 %v899_v23, %v773_v24 }
 0x9c9   :  { %v780_v25 = vmax.f32 %v779_v5, 0.0 }
 0x9cb   :  { %1112 = vmatmul.mubr.msk.f32.vlgmr.msra.gmra.mrb[8].mxu0 %vm230_vm7, %v780_v25 }
 0xa9e   :  { %v863_v27 = vpop.f32.mrb[8].mxu0 }
 0xa9f   :  { %v864_v28 = vadd.f32 %v900_v26, %v863_v27  ;;  %v1113_v29 = vpop.f32.mrb[9].mxu0 }
 0xaa1   :  { %1227 = vtanh.f32 %v864_v28 }
 0xaab   :  { %v1228_v30 = vpop.eup %1227 }
 0xaac   :  { %v869_v31 = vsel %vm867_vm8, %v1228_v30, %v864_v28 }
 0xaad   :  { %871 = vst.msk [vmem:[%s1442_s5] sm:$0xff] %vm870_vm9, %v869_v31 }
 0xaae   :  { %876 = vsyncpa [#allocation3], 1 }

</bundles_post_ra>
